<compile_context>
chip_gen: v7x
topology: tpu7x:2x2x1
jax: 0.10.0
libtpu: 0.0.40
codegen_flags: <defaults>
</compile_context>

<pallas_src>
import functools

import jax
import jax.numpy as jnp
from jax.experimental import pallas as pl
from jax.experimental.pallas import tpu as pltpu


def _mean_std_cat_kernel(x_ref, o_ref, *, F2, L, min_std, TB, W):
    x = x_ref[...]                                  # (TB, W) tile in VMEM
    x32 = x.astype(jnp.float32)

    lane = jax.lax.broadcasted_iota(jnp.int32, x.shape, 1)
    if W == F2:
        col = lane                                  # natural (B, 2L) layout
    elif W % F2 == 0:
        col = lane % F2                             # lane-dense slab, F2 | 128
    else:
        # General lane-dense slab: recover the original column from the
        # global flat element index of this tile.
        row = (jax.lax.broadcasted_iota(jnp.int32, x.shape, 0)
               + pl.program_id(0) * TB)
        col = (row * W + lane) % F2

    # softplus(x) = log(1 + exp(x)); stable form, EUP transcendental in f32.
    std = jnp.logaddexp(x32, 0.0) + jnp.float32(min_std)
    o_ref[...] = jnp.where(col < L, x32, std).astype(o_ref.dtype)


def mean_std_cat(state_dist_params: jax.Array,
                 latent_state_size: int,
                 min_std: float,
                 *,
                 max_rows_per_tile: int = 8192) -> jax.Array:
    B, F2 = state_dist_params.shape
    assert F2 == 2 * latent_state_size, "expected (B, 2*latent_state_size) input"
    L = latent_state_size
    dtype = state_dist_params.dtype
    dtype_bytes = jnp.dtype(dtype).itemsize

    # Present a lane-dense slab to the kernel when 2L is not a multiple of 128.
    LANES = 128
    if F2 % LANES == 0 or (B * F2) % LANES != 0:
        slab, R, W, reshaped = state_dist_params, B, F2, False
    else:
        W = LANES
        R = (B * F2) // W
        slab = state_dist_params.reshape(R, W)
        reshaped = True

    # Row-tile size: as large as fits a conservative VMEM budget so the DMA
    # pipeline runs near the HBM roofline. 2 double-buffers x (in + out).
    vmem_budget = 12 * 1024 * 1024
    per_row_bytes = 4 * W * dtype_bytes
    TB = min(max_rows_per_tile, max(8, vmem_budget // per_row_bytes))
    TB = max(8, (TB // 8) * 8)                      # sublane rule: multiple of 8
    if R <= TB:
        TB = R                                      # full-extent block is always legal
    grid = (pl.cdiv(R, TB),)

    kernel = functools.partial(
        _mean_std_cat_kernel, F2=F2, L=L, min_std=float(min_std), TB=TB, W=W)

    cost = pl.CostEstimate(
        flops=3 * B * F2,
        transcendentals=B * L,
        bytes_accessed=2 * B * F2 * dtype_bytes)

    out = pl.pallas_call(
        kernel,
        out_shape=jax.ShapeDtypeStruct((R, W), dtype),
        grid_spec=pltpu.PrefetchScalarGridSpec(
            num_scalar_prefetch=0,
            grid=grid,
            in_specs=[pl.BlockSpec((TB, W), lambda i: (i, 0))],
            out_specs=pl.BlockSpec((TB, W), lambda i: (i, 0)),
        ),
        compiler_params=pltpu.CompilerParams(
            dimension_semantics=("parallel",)),     # shards across v7x's 2 TCs
        cost_estimate=cost,
    )(slab)

    if reshaped:
        out = out.reshape(B, F2)
    return out


def mean_std_cat_ref(x, latent_state_size, min_std):
    mean = x[:, :latent_state_size]
    std = jax.nn.softplus(x[:, latent_state_size:]) + min_std
    return jnp.concatenate([mean, std], axis=1)


def _check(x, L, min_std, **kw):
    out = jax.block_until_ready(mean_std_cat(x, L, min_std, **kw))
    ref = mean_std_cat_ref(x, L, min_std)
    assert out.shape == ref.shape
    assert jnp.allclose(out, ref, atol=1e-5, rtol=1e-5), "mismatch vs reference"
    return out


if __name__ == "__main__":
    key = jax.random.PRNGKey(0)
    k0, k1, k2, k3 = jax.random.split(key, 4)

    # Primary module-consistent small shape: B=2, latent_state_size=32.
    x0 = jax.random.normal(k0, (2, 64), dtype=jnp.float32)
    _check(x0, 32, 0.1)                             # lane-dense flattened path (F2=64)

    # Feature dim already a multiple of 128 -> natural (B, 2L) path.
    x1 = jax.random.normal(k1, (16, 256), dtype=jnp.float32)
    _check(x1, 128, 0.1)

    # Odd feature dim, not flattenable -> full-extent-column fallback path.
    x2 = jax.random.normal(k2, (3, 40), dtype=jnp.float32)
    _check(x2, 20, 0.05)

    # Multi-step grid with a ragged last row-tile (exercises the pipelined path).
    x3 = jax.random.normal(k3, (20, 256), dtype=jnp.float32)
    _check(x3, 128, 0.1, max_rows_per_tile=8)

    print("KERNEL_OK")
</pallas_src>

<mosaic_0001>
module attributes {stable_mosaic.version = 11 : i64} {
  func.func @_mean_std_cat_kernel(%arg0: i32, %arg1: memref<1x128xf32, #tpu.memory_space<vmem>>, %arg2: memref<1x128xf32, #tpu.memory_space<vmem>>) attributes {dimension_semantics = [#tpu.dimension_semantics<parallel>], iteration_bounds = array<i64: 1>, scalar_prefetch = 0 : i64, scratch_operands = 0 : i64, tpu.core_type = #tpu.core_type<tc>, window_params = [{transform_indices = @transform_0, window_bounds = array<i64: 1, 128>}, {transform_indices = @transform_1, window_bounds = array<i64: 1, 128>}]} {
    %c0 = arith.constant 0 : index
    %c0_0 = arith.constant 0 : index
    %0 = vector.load %arg1[%c0, %c0_0] : memref<1x128xf32, #tpu.memory_space<vmem>>, vector<1x128xf32>
    %1 = tpu.iota {dimensions = array<i32: 1>} : vector<1x128xi32>
    %c64_i32 = arith.constant 64 : i32
    %c0_i32 = arith.constant 0 : i32
    %2 = arith.cmpi eq, %c64_i32, %c0_i32 : i32
    %c1_i32 = arith.constant 1 : i32
    %3 = arith.select %2, %c1_i32, %c64_i32 : i32
    %4 = vector.broadcast %3 : i32 to vector<1x128xi32>
    %5 = arith.remsi %1, %4 : vector<1x128xi32>
    %c0_i32_1 = arith.constant 0 : i32
    %6 = vector.broadcast %c0_i32_1 : i32 to vector<1x128xi32>
    %7 = arith.cmpi ne, %5, %6 : vector<1x128xi32>
    %c0_i32_2 = arith.constant 0 : i32
    %8 = vector.broadcast %c0_i32_2 : i32 to vector<1x128xi32>
    %9 = arith.cmpi slt, %5, %8 : vector<1x128xi32>
    %c0_i32_3 = arith.constant 0 : i32
    %10 = arith.cmpi slt, %3, %c0_i32_3 : i32
    %11 = vector.broadcast %10 : i1 to vector<1x128xi1>
    %12 = vector.broadcast %11 : vector<1x128xi1> to vector<1x128xi1>
    %13 = arith.xori %9, %12 : vector<1x128xi1>
    %14 = arith.andi %13, %7 : vector<1x128xi1>
    %15 = vector.broadcast %3 : i32 to vector<1x128xi32>
    %16 = arith.addi %5, %15 : vector<1x128xi32>
    %17 = arith.select %14, %16, %5 : vector<1x128xi1>, vector<1x128xi32>
    %cst = arith.constant 0.000000e+00 : f32
    %18 = vector.broadcast %cst : f32 to vector<1x128xf32>
    %19 = arith.maximumf %0, %18 : vector<1x128xf32>
    %20 = vector.broadcast %cst : f32 to vector<1x128xf32>
    %21 = arith.subf %0, %20 : vector<1x128xf32>
    %22 = arith.cmpf one, %21, %21 : vector<1x128xf32>
    %23 = vector.broadcast %cst : f32 to vector<1x128xf32>
    %24 = arith.addf %0, %23 : vector<1x128xf32>
    %25 = math.absf %21 : vector<1x128xf32>
    %cst_4 = arith.constant 0.000000e+00 : f32
    %26 = vector.broadcast %cst_4 : f32 to vector<1x128xf32>
    %27 = arith.subf %26, %25 : vector<1x128xf32>
    %28 = math.exp %27 : vector<1x128xf32>
    %29 = math.log1p %28 : vector<1x128xf32>
    %30 = arith.addf %19, %29 : vector<1x128xf32>
    %31 = arith.select %22, %24, %30 : vector<1x128xi1>, vector<1x128xf32>
    %cst_5 = arith.constant 1.000000e-01 : f32
    %32 = vector.broadcast %cst_5 : f32 to vector<1x128xf32>
    %33 = arith.addf %31, %32 : vector<1x128xf32>
    %c32_i32 = arith.constant 32 : i32
    %34 = vector.broadcast %c32_i32 : i32 to vector<1x128xi32>
    %35 = arith.cmpi slt, %17, %34 : vector<1x128xi32>
    %36 = arith.select %35, %0, %33 : vector<1x128xi1>, vector<1x128xf32>
    %c0_6 = arith.constant 0 : index
    %c0_7 = arith.constant 0 : index
    %37 = vector.load %arg2[%c0_6, %c0_7] : memref<1x128xf32, #tpu.memory_space<vmem>>, vector<1x128xf32>
    tpu.vector_store %arg2[%c0_6, %c0_7], %36 {strides = array<i32>} : memref<1x128xf32, #tpu.memory_space<vmem>>, vector<1x128xf32>,
    return
  }
  func.func @transform_0(%arg0: i32) -> (i32, i32) {
    %c0_i32 = arith.constant 0 : i32
    %c0_i32_0 = arith.constant 0 : i32
    return %arg0, %c0_i32 : i32, i32
  }
  func.func @transform_1(%arg0: i32) -> (i32, i32) {
    %c0_i32 = arith.constant 0 : i32
    %c0_i32_0 = arith.constant 0 : i32
    return %arg0, %c0_i32 : i32, i32
  }
}

</mosaic_0001>

<bundles_post_ra>
// kernel: tpu_custom_call.1
= control target key start
LH: loop header
LB: loop body
LE: loop exit
PB: predicated region body
PF: predicated region fallthrough
CT: control target
= control target key end

     0   :  { %6 = vsyncpa [#allocation3], 0  ;;  %s163_s0 = inlined_call_operand.hbm [shape: f32[1,128], index: 0, kind: input, shape index: {}]   ;;  %s164_s1 = inlined_call_operand.hbm [shape: f32[1,128], index: 1, kind: output, shape index: {}]  }
   0x1   :  { %7 = vsyncpa [#allocation4], 0  ;;  %s127_s6 = smov [#allocation2]   ;;  %s79_s10 = scalar_lea.hbm %s163_s0, 16 }
   0x2   :  { %s14_s7 = sshll.u32 %s127_s6, 4  ;;  %p80_p0 = scmp.ne.s32.totalorder %s163_s0, %s79_s10  ;;  %s15_s7 = int_to_ptr.vmem [resolvable:$true] %s14_s7 }
   0x3   :  { %p83_p1 = scmp.lt.u32.totalorder %s79_s10, %s163_s0 }
   0x5   :  { %p85_p2 = pnand %p83_p1, %p80_p0 }
   0x7   :  { %88 = shalt.err (!%p85_p2)
}
   0x8   :  { %s89_s15 = scalar_lea.vmem %s15_s7, 16  ;;  %s93_s16 = scalar_lea.vmem %s15_s7, 32 }
   0x9   :  { %p90_p3 = scmp.ne.s32.totalorder %s15_s7, %s89_s15  ;;  %p94_p4 = scmp.lt.s32.totalorder %s15_s7, %s15_s7 }
   0xa   :  { %p95_p5 = scmp.lt.s32.totalorder %s93_s16, %s89_s15 }
   0xc   :  { %p96_p6 = por %p95_p5, %p94_p4 }
   0xe   :  { %p97_p7 = pnand %p96_p6, %p90_p3 }
  0x10   :  { %100 = shalt.err (!%p97_p7)
}
  0x11   :  { %17 = dma.hbm_to_vmem [thread:$0]  %s163_s0, 16, %s15_s7, [#allocation3]  }
  0x12   :  { %123 = dma.done.wait [#allocation3], 16  }
  0x13   :  { %124 = vsyncadd [#allocation3], 4294967280  ;;  %v21_v0 = vld [vmem:[#allocation2] sm:$0x1]  ;;  %v22_v7 = vlaneseq  ;;  %s128_s0 = smov [#allocation5]  }
  0x14   :  { %v39_v1 = vand.u32 2147483647, %v21_v0  ;;  %v36_v13 = vmax.f32 %v21_v0, 0.0  ;;  %vm37_vm1 = vcmp.ne.f32.partialorder %v21_v0, %v21_v0  ;;  %s64_s19 = sshll.u32 %s128_s0, 4  ;;  %s65_s19 = int_to_ptr.vmem [resolvable:$true] %s64_s19 }
  0x15   :  { %v23_v10 = vand.u32 127, %v22_v7  ;;  %s101_s20 = scalar_lea.vmem %s65_s19, 16  ;;  %s105_s21 = scalar_lea.vmem %s65_s19, 32 }
  0x16   :  { %v40_v2 = vsub.f32 0.0, %v39_v1  ;;  %p102_p8 = scmp.ne.s32.totalorder %s65_s19, %s101_s20  ;;  %p106_p9 = scmp.lt.s32.totalorder %s65_s19, %s65_s19 }
  0x17   :  { %v28_v15 = vand.u32 63, %v23_v10  ;;  %p107_p10 = scmp.lt.s32.totalorder %s105_s21, %s101_s20 }
  0x18   :  { %v41_v3 = vmul.f32 1.442695, %v40_v2 }
  0x19   :  { %vm55_vm2 = vcmp.lt.s32.totalorder %v28_v15, 32  ;;  %p108_p11 = por %p107_p10, %p106_p9 }
  0x1a   :  { %75 = vpow2.f32 %v41_v3 }
  0x1b   :  { %p109_p12 = pnand %p108_p11, %p102_p8 }
  0x24   :  { %v76_v4 = vpop.eup %75 }
  0x25   :  { %v43_v5 = vadd.f32 1.0, %v76_v4  ;;  %v46_v6 = vmul.f32 -0.5, %v76_v4  ;;  %v49_v9 = vand.u32 2147483647, %v76_v4 }
  0x27   :  { %77 = vlog2.f32 %v43_v5  ;;  %v47_v8 = vadd.f32 1.0, %v46_v6  ;;  %vm50_vm0 = vcmp.lt.f32.partialorder %v49_v9, 0.0004427343 }
  0x29   :  { %v48_v11 = vmul.f32 %v76_v4, %v47_v8 }
  0x31   :  { %v78_v12 = vpop.eup %77 }
  0x32   :  { %v45_v14 = vmul.f32 0.6931472, %v78_v12 }
  0x34   :  { %v51_v16 = vsel %vm50_vm0, %v48_v11, %v45_v14 }
  0x35   :  { %v52_v17 = vadd.f32 %v51_v16, %v36_v13 }
  0x37   :  { %v53_v18 = vsel %vm37_vm1, %v21_v0, %v52_v17 }
  0x38   :  { %v54_v19 = vadd.f32 0.1, %v53_v18 }
  0x3a   :  { %v56_v20 = vsel %vm55_vm2, %v21_v0, %v54_v19 }
  0x3b   :  { %57 = vst [vmem:[#allocation5] sm:$0x1] %v56_v20 }
  0x3c   :  { %112 = shalt.err (!%p109_p12)
}
  0x3d   :  { %s113_s24 = scalar_lea.hbm %s164_s1, 16 }
  0x3e   :  { %p114_p13 = scmp.ne.s32.totalorder %s164_s1, %s113_s24  ;;  %p117_p0 = scmp.lt.u32.totalorder %s113_s24, %s164_s1 }
  0x40   :  { %p119_p1 = pnand %p117_p0, %p114_p13 }
  0x42   :  { %122 = shalt.err (!%p119_p1)
}
  0x43   :  { %67 = dma.vmem_to_hbm [thread:$0]  %s65_s19, 16, %s164_s1, [#allocation4]  }
  0x44   :  { %125 = dma.done.wait [#allocation4], 16  }
  0x45   :  { %126 = vsyncadd [#allocation4], 4294967280 }
  0x46   :  { %71 = vsyncpa [#allocation3], 1 }
  0x47   :  { %72 = vsyncpa [#allocation4], 1 }

</bundles_post_ra>
